<compile_context>
chip_gen: v5e
topology: v5e:2x2
jax: 0.10.0
libtpu: 0.0.40
codegen_flags: <defaults>
</compile_context>

<pallas_src>
import functools

import jax
import jax.numpy as jnp
from jax.experimental import pallas as pl
from jax.experimental.pallas import tpu as pltpu


def _shift_lanes_zerofill(v, off):
    """t[:, p] = v[:, p + off] when 0 <= p + off < HW, else 0 (static off)."""
    if off == 0:
        return v
    n = v.shape[1]
    pad = jnp.zeros((v.shape[0], abs(off)), v.dtype)
    if off > 0:
        return jnp.concatenate([v[:, off:], pad], axis=1)
    return jnp.concatenate([pad, v[:, : n + off]], axis=1)


def se_kernel(x_ref, w1_ref, w2_ref, wc_ref, bc_ref, out_ref, *, H, W):
    """One block of Bb batch elements per grid step.

    x_ref   : (Bb, C, H*W) VMEM  input activations
    w1_ref  : (C//r, C)    VMEM  first FC weight (PyTorch Linear layout: (out, in))
    w2_ref  : (C, C//r)    VMEM  second FC weight
    wc_ref  : (9,)         SMEM  3x3 spatial conv weight, row-major flattened
    bc_ref  : (1,)         SMEM  spatial conv bias
    out_ref : (Bb, C, H*W) VMEM  output
    """
    Bb, C, HW = x_ref.shape

    # ---------- per-element channel pool column and channel mean+max row ----------
    pooled_cols = []
    s_rows = []
    for b in range(Bb):                       # static unroll, Bb kept small
        xb = x_ref[b].astype(jnp.float32)     # (C, HW)
        pooled_cols.append(jnp.sum(xb, axis=1, keepdims=True) * (1.0 / HW))       # (C, 1)
        s_rows.append(jnp.mean(xb, axis=0, keepdims=True)
                      + jnp.max(xb, axis=0, keepdims=True))                       # (1, HW)
    pooled = pooled_cols[0] if Bb == 1 else jnp.concatenate(pooled_cols, axis=1)  # (C, Bb)
    s = s_rows[0] if Bb == 1 else jnp.concatenate(s_rows, axis=0)                 # (Bb, HW)

    # ---------- channel attention, batched over the block ----------
    # Linear(C -> C//r, no bias) -> ReLU -> Linear(C//r -> C, no bias) -> Sigmoid
    h = jnp.maximum(
        jnp.dot(w1_ref[...], pooled, preferred_element_type=jnp.float32), 0.0)    # (Cr, Bb)
    y = jax.nn.sigmoid(
        jnp.dot(w2_ref[...], h, preferred_element_type=jnp.float32))              # (C, Bb)

    # ---------- spatial attention: 3x3 SAME conv on s via static lane shifts ----------
    # Horizontal row-wrap masks, hoisted out of the tap loop.  Vertical out-of-range
    # taps read the zero fill of the shifted slices, so they need no mask.
    col = jax.lax.broadcasted_iota(jnp.int32, (1, HW), 1) % W
    m_left = (col != 0).astype(jnp.float32)        # left-neighbor tap valid
    m_right = (col != W - 1).astype(jnp.float32)   # right-neighbor tap valid

    acc = wc_ref[4] * s                            # center tap: no shift, no mask
    for di in range(3):                            # vertical tap offset (di - 1)
        for dj in range(3):                        # horizontal tap offset (dj - 1)
            if di == 1 and dj == 1:
                continue
            off = (di - 1) * W + (dj - 1)
            tap = _shift_lanes_zerofill(s, off)    # (Bb, HW)
            if dj == 0:
                tap = tap * m_left
            elif dj == 2:
                tap = tap * m_right
            acc = acc + wc_ref[di * 3 + dj] * tap
    att = jax.nn.sigmoid(acc + bc_ref[0])          # (Bb, HW)

    # ---------- fused combine: out = x * (channel_scale + spatial_scale) ----------
    for b in range(Bb):
        xb = x_ref[b].astype(jnp.float32)                     # (C, HW)
        scale = y[:, b:b + 1] + att[b:b + 1, :]               # (C,1)+(1,HW) -> (C,HW)
        out_ref[b] = (xb * scale).astype(out_ref.dtype)


def _pick_block_batch(batch, bytes_per_elem, *, max_unroll=8, target_bytes=2 << 20):
    """Largest divisor of `batch` that (a) keeps the block under target_bytes,
    (b) keeps the in-kernel unroll small, and (c) leaves >= 2 grid steps so both
    v7x TensorCores get work whenever batch >= 2."""
    best = 1
    for cand in range(1, min(batch, max_unroll) + 1):
        if batch % cand:
            continue
        if cand * bytes_per_elem > target_bytes:
            continue
        if batch >= 2 and batch // cand < 2:
            continue
        best = cand
    return best


def se_module(x, w1, w2, wc, bc, *, block_batch=None):
    """x: (B, C, H, W) NCHW (PyTorch convention). Compute is f32; I/O dtype follows x."""
    B, C, H, W = x.shape
    Cr = w1.shape[0]
    HW = H * W
    itemsize = jnp.dtype(x.dtype).itemsize

    if block_batch is None:
        block_batch = _pick_block_batch(B, C * HW * itemsize)
    Bb = block_batch
    assert B % Bb == 0

    x2 = x.reshape(B, C, HW)      # glue: flatten spatial for the kernel layout
    wc9 = wc.reshape(9)           # 1-D SMEM array avoids [8,128]-word SMEM padding

    block_bytes = Bb * C * HW * itemsize
    # in + out blocks, double-buffered, plus weights/headroom; stays v7x-safe (64 MiB).
    vmem_limit = int(min(64 * 1024 * 1024, max(16 * 1024 * 1024, 8 * block_bytes)))

    # Memory-bound op (~read x once + write out once); advisory hint for XLA overlap.
    cost = pl.CostEstimate(
        flops=int(B * (6 * C * HW + 27 * HW + 4 * C * Cr)),
        transcendentals=int(B * (C + HW)),
        bytes_accessed=int(2 * B * C * HW * itemsize + 2 * C * Cr * 4 + 40),
    )

    kernel = functools.partial(se_kernel, H=H, W=W)

    out2d = pl.pallas_call(
        kernel,
        out_shape=jax.ShapeDtypeStruct((B, C, HW), x.dtype),
        grid_spec=pltpu.PrefetchScalarGridSpec(
            num_scalar_prefetch=0,
            grid=(B // Bb,),
            in_specs=[
                pl.BlockSpec((Bb, C, HW), lambda i: (i, 0, 0)),
                pl.BlockSpec((Cr, C), lambda i: (0, 0)),   # same block every step: stays resident
                pl.BlockSpec((C, Cr), lambda i: (0, 0)),
                pl.BlockSpec(memory_space=pltpu.MemorySpace.SMEM),  # (9,) conv weight
                pl.BlockSpec(memory_space=pltpu.MemorySpace.SMEM),  # (1,) conv bias
            ],
            out_specs=pl.BlockSpec((Bb, C, HW), lambda i: (i, 0, 0)),
        ),
        compiler_params=pltpu.CompilerParams(
            dimension_semantics=("parallel",),
            vmem_limit_bytes=vmem_limit,
        ),
        cost_estimate=cost,
    )(x2, w1, w2, wc9, bc)

    return out2d.reshape(B, C, H, W)


def se_reference(x, w1, w2, wc, bc):
    """Pure-JAX reference matching the PyTorch SeModule forward."""
    pooled = jnp.mean(x, axis=(2, 3))                       # (B, C)
    h = jax.nn.relu(pooled @ w1.T)                          # (B, C//r)
    y = jax.nn.sigmoid(h @ w2.T)                            # (B, C)
    out1 = x * y[:, :, None, None]

    s = jnp.mean(x, axis=1, keepdims=True) + jnp.max(x, axis=1, keepdims=True)  # (B,1,H,W)
    conv = jax.lax.conv_general_dilated(
        s, wc[None, None, :, :], window_strides=(1, 1), padding="SAME",
        dimension_numbers=("NCHW", "OIHW", "NCHW"),
    ) + bc[0]
    att = jax.nn.sigmoid(conv)                              # (B, 1, H, W)
    return out1 + att * x


if __name__ == "__main__":
    B, C, H, W = 4, 8, 16, 16
    reduction = 4
    Cr = C // reduction

    key = jax.random.PRNGKey(0)
    k1, k2, k3, k4, k5 = jax.random.split(key, 5)
    x = jax.random.normal(k1, (B, C, H, W), dtype=jnp.float32)
    # deterministic synthetic parameters (shapes from the module's __init__)
    w1 = 0.25 * jax.random.normal(k2, (Cr, C), dtype=jnp.float32)   # Linear(C, C//4, bias=False)
    w2 = 0.25 * jax.random.normal(k3, (C, Cr), dtype=jnp.float32)   # Linear(C//4, C, bias=False)
    wc = 0.30 * jax.random.normal(k4, (3, 3), dtype=jnp.float32)    # Conv2d(1,1,3,pad=1) weight
    bc = 0.10 * jax.random.normal(k5, (1,), dtype=jnp.float32)      # Conv2d bias

    out = jax.block_until_ready(se_module(x, w1, w2, wc, bc))       # Bb=2 -> grid=(2,)

    ref = se_reference(x, w1, w2, wc, bc)
    assert out.shape == ref.shape
    max_err = float(jnp.max(jnp.abs(out - ref)))
    assert jnp.allclose(out, ref, atol=2e-3, rtol=2e-3), max_err

    print("KERNEL_OK")
</pallas_src>

<mosaic_0001>
module attributes {stable_mosaic.version = 11 : i64} {
  func.func @se_kernel(%arg0: i32, %arg1: memref<2x8x256xf32, #tpu.memory_space<vmem>>, %arg2: memref<2x8xf32, #tpu.memory_space<vmem>>, %arg3: memref<8x2xf32, #tpu.memory_space<vmem>>, %arg4: memref<9xf32, #tpu.memory_space<smem>>, %arg5: memref<1xf32, #tpu.memory_space<smem>>, %arg6: memref<2x8x256xf32, #tpu.memory_space<vmem>>) attributes {dimension_semantics = [#tpu.dimension_semantics<parallel>], iteration_bounds = array<i64: 2>, scalar_prefetch = 0 : i64, scratch_operands = 0 : i64, tpu.core_type = #tpu.core_type<tc>, window_params = [{transform_indices = @transform_0, window_bounds = array<i64: 2, 8, 256>}, {pipeline_mode = #tpu.pipeline_mode<synchronous>, transform_indices = @transform_1, window_bounds = array<i64: 2, 8>}, {pipeline_mode = #tpu.pipeline_mode<synchronous>, transform_indices = @transform_2, window_bounds = array<i64: 8, 2>}, {transform_indices = @transform_3, window_bounds = array<i64: 9>}, {transform_indices = @transform_4, window_bounds = array<i64: 1>}, {transform_indices = @transform_5, window_bounds = array<i64: 2, 8, 256>}]} {
    %c0 = arith.constant 0 : index
    %c0_0 = arith.constant 0 : index
    %c0_1 = arith.constant 0 : index
    %0 = vector.load %arg1[%c0, %c0_0, %c0_1] : memref<2x8x256xf32, #tpu.memory_space<vmem>>, vector<1x8x256xf32>
    %1 = vector.shape_cast %0 : vector<1x8x256xf32> to vector<8x256xf32>
    %cst = arith.constant dense<0.000000e+00> : vector<8xf32>
    %2 = vector.multi_reduction <add>, %1, %cst [1] : vector<8x256xf32> to vector<8xf32>
    %3 = vector.shape_cast %2 : vector<8xf32> to vector<8x1xf32>
    %cst_2 = arith.constant 3.906250e-03 : f32
    %4 = vector.broadcast %cst_2 : f32 to vector<8x1xf32>
    %5 = arith.mulf %3, %4 : vector<8x1xf32>
    %cst_3 = arith.constant dense<0.000000e+00> : vector<256xf32>
    %6 = vector.multi_reduction <add>, %1, %cst_3 [0] : vector<8x256xf32> to vector<256xf32>
    %7 = vector.shape_cast %6 : vector<256xf32> to vector<1x256xf32>
    %cst_4 = arith.constant 8.000000e+00 : f32
    %8 = vector.broadcast %cst_4 : f32 to vector<1x256xf32>
    %9 = arith.divf %7, %8 : vector<1x256xf32>
    %cst_5 = arith.constant dense<0xFF800000> : vector<256xf32>
    %10 = vector.multi_reduction <maximumf>, %1, %cst_5 [0] : vector<8x256xf32> to vector<256xf32>
    %11 = vector.shape_cast %10 : vector<256xf32> to vector<1x256xf32>
    %12 = arith.addf %9, %11 : vector<1x256xf32>
    %c1 = arith.constant 1 : index
    %c0_6 = arith.constant 0 : index
    %c0_7 = arith.constant 0 : index
    %13 = vector.load %arg1[%c1, %c0_6, %c0_7] : memref<2x8x256xf32, #tpu.memory_space<vmem>>, vector<1x8x256xf32>
    %14 = vector.shape_cast %13 : vector<1x8x256xf32> to vector<8x256xf32>
    %cst_8 = arith.constant dense<0.000000e+00> : vector<8xf32>
    %15 = vector.multi_reduction <add>, %14, %cst_8 [1] : vector<8x256xf32> to vector<8xf32>
    %16 = vector.shape_cast %15 : vector<8xf32> to vector<8x1xf32>
    %cst_9 = arith.constant 3.906250e-03 : f32
    %17 = vector.broadcast %cst_9 : f32 to vector<8x1xf32>
    %18 = arith.mulf %16, %17 : vector<8x1xf32>
    %cst_10 = arith.constant dense<0.000000e+00> : vector<256xf32>
    %19 = vector.multi_reduction <add>, %14, %cst_10 [0] : vector<8x256xf32> to vector<256xf32>
    %20 = vector.shape_cast %19 : vector<256xf32> to vector<1x256xf32>
    %cst_11 = arith.constant 8.000000e+00 : f32
    %21 = vector.broadcast %cst_11 : f32 to vector<1x256xf32>
    %22 = arith.divf %20, %21 : vector<1x256xf32>
    %cst_12 = arith.constant dense<0xFF800000> : vector<256xf32>
    %23 = vector.multi_reduction <maximumf>, %14, %cst_12 [0] : vector<8x256xf32> to vector<256xf32>
    %24 = vector.shape_cast %23 : vector<256xf32> to vector<1x256xf32>
    %25 = arith.addf %22, %24 : vector<1x256xf32>
    %26 = tpu.concatenate %5, %18 in 1 : vector<8x1xf32>, vector<8x1xf32> -> vector<8x2xf32>
    %27 = tpu.concatenate %12, %25 in 0 : vector<1x256xf32>, vector<1x256xf32> -> vector<2x256xf32>
    %c0_13 = arith.constant 0 : index
    %c0_14 = arith.constant 0 : index
    %28 = vector.load %arg2[%c0_13, %c0_14] : memref<2x8xf32, #tpu.memory_space<vmem>>, vector<2x8xf32>
    %cst_15 = arith.constant dense<0.000000e+00> : vector<2x2xf32>
    %29 = tpu.matmul %28, %26, %cst_15 {dimension_numbers = #tpu.dot_dimension_numbers<[1], [0], [0], [1], [0, 0, 1, 1], [], []>} : vector<2x8xf32>, vector<8x2xf32>, vector<2x2xf32> -> vector<2x2xf32>
    %cst_16 = arith.constant 0.000000e+00 : f32
    %30 = vector.broadcast %cst_16 : f32 to vector<2x2xf32>
    %31 = arith.maximumf %29, %30 : vector<2x2xf32>
    %c0_17 = arith.constant 0 : index
    %c0_18 = arith.constant 0 : index
    %32 = vector.load %arg3[%c0_17, %c0_18] : memref<8x2xf32, #tpu.memory_space<vmem>>, vector<8x2xf32>
    %cst_19 = arith.constant dense<0.000000e+00> : vector<8x2xf32>
    %33 = tpu.matmul %32, %31, %cst_19 {dimension_numbers = #tpu.dot_dimension_numbers<[1], [0], [0], [1], [0, 0, 1, 1], [], []>} : vector<8x2xf32>, vector<2x2xf32>, vector<8x2xf32> -> vector<8x2xf32>
    %34 = arith.negf %33 : vector<8x2xf32>
    %35 = math.exp %34 : vector<8x2xf32>
    %cst_20 = arith.constant 1.000000e+00 : f32
    %36 = vector.broadcast %cst_20 : f32 to vector<8x2xf32>
    %37 = arith.addf %36, %35 : vector<8x2xf32>
    %38 = arith.divf %36, %37 : vector<8x2xf32>
    %39 = tpu.iota {dimensions = array<i32: 1>} : vector<1x256xi32>
    %c16_i32 = arith.constant 16 : i32
    %c0_i32 = arith.constant 0 : i32
    %40 = arith.cmpi eq, %c16_i32, %c0_i32 : i32
    %c1_i32 = arith.constant 1 : i32
    %41 = arith.select %40, %c1_i32, %c16_i32 : i32
    %42 = vector.broadcast %41 : i32 to vector<1x256xi32>
    %43 = arith.remsi %39, %42 : vector<1x256xi32>
    %c0_i32_21 = arith.constant 0 : i32
    %44 = vector.broadcast %c0_i32_21 : i32 to vector<1x256xi32>
    %45 = arith.cmpi ne, %43, %44 : vector<1x256xi32>
    %c0_i32_22 = arith.constant 0 : i32
    %46 = vector.broadcast %c0_i32_22 : i32 to vector<1x256xi32>
    %47 = arith.cmpi slt, %43, %46 : vector<1x256xi32>
    %c0_i32_23 = arith.constant 0 : i32
    %48 = arith.cmpi slt, %41, %c0_i32_23 : i32
    %49 = vector.broadcast %48 : i1 to vector<1x256xi1>
    %50 = vector.broadcast %49 : vector<1x256xi1> to vector<1x256xi1>
    %51 = arith.xori %47, %50 : vector<1x256xi1>
    %52 = arith.andi %51, %45 : vector<1x256xi1>
    %53 = vector.broadcast %41 : i32 to vector<1x256xi32>
    %54 = arith.addi %43, %53 : vector<1x256xi32>
    %55 = arith.select %52, %54, %43 : vector<1x256xi1>, vector<1x256xi32>
    %c0_i32_24 = arith.constant 0 : i32
    %56 = vector.broadcast %c0_i32_24 : i32 to vector<1x256xi32>
    %57 = arith.cmpi ne, %55, %56 : vector<1x256xi32>
    %58 = arith.extui %57 : vector<1x256xi1> to vector<1x256xi32>
    %59 = arith.sitofp %58 : vector<1x256xi32> to vector<1x256xf32>
    %c15_i32 = arith.constant 15 : i32
    %60 = vector.broadcast %c15_i32 : i32 to vector<1x256xi32>
    %61 = arith.cmpi ne, %55, %60 : vector<1x256xi32>
    %62 = arith.extui %61 : vector<1x256xi1> to vector<1x256xi32>
    %63 = arith.sitofp %62 : vector<1x256xi32> to vector<1x256xf32>
    %c4 = arith.constant 4 : index
    %64 = memref.load %arg4[%c4] : memref<9xf32, #tpu.memory_space<smem>>
    %65 = vector.broadcast %64 : f32 to vector<2x256xf32>
    %66 = arith.mulf %65, %27 : vector<2x256xf32>
    %cst_25 = arith.constant 0.000000e+00 : f32
    %67 = vector.broadcast %cst_25 : f32 to vector<2x17xf32>
    %68 = vector.extract_strided_slice %27 {offsets = [0, 0], sizes = [2, 239], strides = [1, 1]} : vector<2x256xf32> to vector<2x239xf32>
    %69 = tpu.concatenate %67, %68 in 1 : vector<2x17xf32>, vector<2x239xf32> -> vector<2x256xf32>
    %70 = vector.broadcast %59 : vector<1x256xf32> to vector<2x256xf32>
    %71 = arith.mulf %69, %70 : vector<2x256xf32>
    %c0_26 = arith.constant 0 : index
    %72 = memref.load %arg4[%c0_26] : memref<9xf32, #tpu.memory_space<smem>>
    %73 = vector.broadcast %72 : f32 to vector<2x256xf32>
    %74 = arith.mulf %73, %71 : vector<2x256xf32>
    %75 = arith.addf %66, %74 : vector<2x256xf32>
    %cst_27 = arith.constant 0.000000e+00 : f32
    %76 = vector.broadcast %cst_27 : f32 to vector<2x16xf32>
    %77 = vector.extract_strided_slice %27 {offsets = [0, 0], sizes = [2, 240], strides = [1, 1]} : vector<2x256xf32> to vector<2x240xf32>
    %78 = tpu.concatenate %76, %77 in 1 : vector<2x16xf32>, vector<2x240xf32> -> vector<2x256xf32>
    %c1_28 = arith.constant 1 : index
    %79 = memref.load %arg4[%c1_28] : memref<9xf32, #tpu.memory_space<smem>>
    %80 = vector.broadcast %79 : f32 to vector<2x256xf32>
    %81 = arith.mulf %80, %78 : vector<2x256xf32>
    %82 = arith.addf %75, %81 : vector<2x256xf32>
    %cst_29 = arith.constant 0.000000e+00 : f32
    %83 = vector.broadcast %cst_29 : f32 to vector<2x15xf32>
    %84 = vector.extract_strided_slice %27 {offsets = [0, 0], sizes = [2, 241], strides = [1, 1]} : vector<2x256xf32> to vector<2x241xf32>
    %85 = tpu.concatenate %83, %84 in 1 : vector<2x15xf32>, vector<2x241xf32> -> vector<2x256xf32>
    %86 = vector.broadcast %63 : vector<1x256xf32> to vector<2x256xf32>
    %87 = arith.mulf %85, %86 : vector<2x256xf32>
    %c2 = arith.constant 2 : index
    %88 = memref.load %arg4[%c2] : memref<9xf32, #tpu.memory_space<smem>>
    %89 = vector.broadcast %88 : f32 to vector<2x256xf32>
    %90 = arith.mulf %89, %87 : vector<2x256xf32>
    %91 = arith.addf %82, %90 : vector<2x256xf32>
    %cst_30 = arith.constant 0.000000e+00 : f32
    %92 = vector.broadcast %cst_30 : f32 to vector<2x1xf32>
    %93 = vector.extract_strided_slice %27 {offsets = [0, 0], sizes = [2, 255], strides = [1, 1]} : vector<2x256xf32> to vector<2x255xf32>
    %94 = tpu.concatenate %92, %93 in 1 : vector<2x1xf32>, vector<2x255xf32> -> vector<2x256xf32>
    %95 = vector.broadcast %59 : vector<1x256xf32> to vector<2x256xf32>
    %96 = arith.mulf %94, %95 : vector<2x256xf32>
    %c3 = arith.constant 3 : index
    %97 = memref.load %arg4[%c3] : memref<9xf32, #tpu.memory_space<smem>>
    %98 = vector.broadcast %97 : f32 to vector<2x256xf32>
    %99 = arith.mulf %98, %96 : vector<2x256xf32>
    %100 = arith.addf %91, %99 : vector<2x256xf32>
    %cst_31 = arith.constant 0.000000e+00 : f32
    %101 = vector.broadcast %cst_31 : f32 to vector<2x1xf32>
    %102 = vector.extract_strided_slice %27 {offsets = [0, 1], sizes = [2, 255], strides = [1, 1]} : vector<2x256xf32> to vector<2x255xf32>
    %103 = tpu.concatenate %102, %101 in 1 : vector<2x255xf32>, vector<2x1xf32> -> vector<2x256xf32>
    %104 = vector.broadcast %63 : vector<1x256xf32> to vector<2x256xf32>
    %105 = arith.mulf %103, %104 : vector<2x256xf32>
    %c5 = arith.constant 5 : index
    %106 = memref.load %arg4[%c5] : memref<9xf32, #tpu.memory_space<smem>>
    %107 = vector.broadcast %106 : f32 to vector<2x256xf32>
    %108 = arith.mulf %107, %105 : vector<2x256xf32>
    %109 = arith.addf %100, %108 : vector<2x256xf32>
    %cst_32 = arith.constant 0.000000e+00 : f32
    %110 = vector.broadcast %cst_32 : f32 to vector<2x15xf32>
    %111 = vector.extract_strided_slice %27 {offsets = [0, 15], sizes = [2, 241], strides = [1, 1]} : vector<2x256xf32> to vector<2x241xf32>
    %112 = tpu.concatenate %111, %110 in 1 : vector<2x241xf32>, vector<2x15xf32> -> vector<2x256xf32>
    %113 = vector.broadcast %59 : vector<1x256xf32> to vector<2x256xf32>
    %114 = arith.mulf %112, %113 : vector<2x256xf32>
    %c6 = arith.constant 6 : index
    %115 = memref.load %arg4[%c6] : memref<9xf32, #tpu.memory_space<smem>>
    %116 = vector.broadcast %115 : f32 to vector<2x256xf32>
    %117 = arith.mulf %116, %114 : vector<2x256xf32>
    %118 = arith.addf %109, %117 : vector<2x256xf32>
    %cst_33 = arith.constant 0.000000e+00 : f32
    %119 = vector.broadcast %cst_33 : f32 to vector<2x16xf32>
    %120 = vector.extract_strided_slice %27 {offsets = [0, 16], sizes = [2, 240], strides = [1, 1]} : vector<2x256xf32> to vector<2x240xf32>
    %121 = tpu.concatenate %120, %119 in 1 : vector<2x240xf32>, vector<2x16xf32> -> vector<2x256xf32>
    %c7 = arith.constant 7 : index
    %122 = memref.load %arg4[%c7] : memref<9xf32, #tpu.memory_space<smem>>
    %123 = vector.broadcast %122 : f32 to vector<2x256xf32>
    %124 = arith.mulf %123, %121 : vector<2x256xf32>
    %125 = arith.addf %118, %124 : vector<2x256xf32>
    %cst_34 = arith.constant 0.000000e+00 : f32
    %126 = vector.broadcast %cst_34 : f32 to vector<2x17xf32>
    %127 = vector.extract_strided_slice %27 {offsets = [0, 17], sizes = [2, 239], strides = [1, 1]} : vector<2x256xf32> to vector<2x239xf32>
    %128 = tpu.concatenate %127, %126 in 1 : vector<2x239xf32>, vector<2x17xf32> -> vector<2x256xf32>
    %129 = vector.broadcast %63 : vector<1x256xf32> to vector<2x256xf32>
    %130 = arith.mulf %128, %129 : vector<2x256xf32>
    %c8 = arith.constant 8 : index
    %131 = memref.load %arg4[%c8] : memref<9xf32, #tpu.memory_space<smem>>
    %132 = vector.broadcast %131 : f32 to vector<2x256xf32>
    %133 = arith.mulf %132, %130 : vector<2x256xf32>
    %134 = arith.addf %125, %133 : vector<2x256xf32>
    %c0_35 = arith.constant 0 : index
    %135 = memref.load %arg5[%c0_35] : memref<1xf32, #tpu.memory_space<smem>>
    %136 = vector.broadcast %135 : f32 to vector<2x256xf32>
    %137 = arith.addf %134, %136 : vector<2x256xf32>
    %138 = arith.negf %137 : vector<2x256xf32>
    %139 = math.exp %138 : vector<2x256xf32>
    %cst_36 = arith.constant 1.000000e+00 : f32
    %140 = vector.broadcast %cst_36 : f32 to vector<2x256xf32>
    %141 = arith.addf %140, %139 : vector<2x256xf32>
    %142 = arith.divf %140, %141 : vector<2x256xf32>
    %c0_37 = arith.constant 0 : index
    %c0_38 = arith.constant 0 : index
    %c0_39 = arith.constant 0 : index
    %143 = vector.load %arg1[%c0_37, %c0_38, %c0_39] : memref<2x8x256xf32, #tpu.memory_space<vmem>>, vector<1x8x256xf32>
    %144 = vector.shape_cast %143 : vector<1x8x256xf32> to vector<8x256xf32>
    %145 = vector.extract_strided_slice %38 {offsets = [0, 0], sizes = [8, 1], strides = [1, 1]} : vector<8x2xf32> to vector<8x1xf32>
    %146 = vector.extract_strided_slice %142 {offsets = [0, 0], sizes = [1, 256], strides = [1, 1]} : vector<2x256xf32> to vector<1x256xf32>
    %147 = vector.broadcast %145 : vector<8x1xf32> to vector<8x256xf32>
    %148 = vector.broadcast %146 : vector<1x256xf32> to vector<8x256xf32>
    %149 = arith.addf %147, %148 : vector<8x256xf32>
    %150 = arith.mulf %144, %149 : vector<8x256xf32>
    %c0_40 = arith.constant 0 : index
    %c0_41 = arith.constant 0 : index
    %c0_42 = arith.constant 0 : index
    %151 = vector.load %arg6[%c0_40, %c0_41, %c0_42] : memref<2x8x256xf32, #tpu.memory_space<vmem>>, vector<1x8x256xf32>
    %152 = vector.shape_cast %151 : vector<1x8x256xf32> to vector<8x256xf32>
    %153 = vector.shape_cast %150 : vector<8x256xf32> to vector<1x8x256xf32>
    tpu.vector_store %arg6[%c0_40, %c0_41, %c0_42], %153 {strides = array<i32>} : memref<2x8x256xf32, #tpu.memory_space<vmem>>, vector<1x8x256xf32>,
    %c1_43 = arith.constant 1 : index
    %c0_44 = arith.constant 0 : index
    %c0_45 = arith.constant 0 : index
    %154 = vector.load %arg1[%c1_43, %c0_44, %c0_45] : memref<2x8x256xf32, #tpu.memory_space<vmem>>, vector<1x8x256xf32>
    %155 = vector.shape_cast %154 : vector<1x8x256xf32> to vector<8x256xf32>
    %156 = vector.extract_strided_slice %38 {offsets = [0, 1], sizes = [8, 1], strides = [1, 1]} : vector<8x2xf32> to vector<8x1xf32>
    %157 = vector.extract_strided_slice %142 {offsets = [1, 0], sizes = [1, 256], strides = [1, 1]} : vector<2x256xf32> to vector<1x256xf32>
    %158 = vector.broadcast %156 : vector<8x1xf32> to vector<8x256xf32>
    %159 = vector.broadcast %157 : vector<1x256xf32> to vector<8x256xf32>
    %160 = arith.addf %158, %159 : vector<8x256xf32>
    %161 = arith.mulf %155, %160 : vector<8x256xf32>
    %c1_46 = arith.constant 1 : index
    %c0_47 = arith.constant 0 : index
    %c0_48 = arith.constant 0 : index
    %162 = vector.load %arg6[%c1_46, %c0_47, %c0_48] : memref<2x8x256xf32, #tpu.memory_space<vmem>>, vector<1x8x256xf32>
    %163 = vector.shape_cast %162 : vector<1x8x256xf32> to vector<8x256xf32>
    %164 = vector.shape_cast %161 : vector<8x256xf32> to vector<1x8x256xf32>
    tpu.vector_store %arg6[%c1_46, %c0_47, %c0_48], %164 {strides = array<i32>} : memref<2x8x256xf32, #tpu.memory_space<vmem>>, vector<1x8x256xf32>,
    return
  }
  func.func @transform_0(%arg0: i32) -> (i32, i32, i32) {
    %c0_i32 = arith.constant 0 : i32
    %c0_i32_0 = arith.constant 0 : i32
    %c0_i32_1 = arith.constant 0 : i32
    return %arg0, %c0_i32, %c0_i32_0 : i32, i32, i32
  }
  func.func @transform_1(%arg0: i32) -> (i32, i32) {
    %c0_i32 = arith.constant 0 : i32
    %c0_i32_0 = arith.constant 0 : i32
    %c0_i32_1 = arith.constant 0 : i32
    return %c0_i32, %c0_i32_0 : i32, i32
  }
  func.func @transform_2(%arg0: i32) -> (i32, i32) {
    %c0_i32 = arith.constant 0 : i32
    %c0_i32_0 = arith.constant 0 : i32
    %c0_i32_1 = arith.constant 0 : i32
    return %c0_i32, %c0_i32_0 : i32, i32
  }
  func.func @transform_3(%arg0: i32) -> i32 {
    %c0_i32 = arith.constant 0 : i32
    %c0_i32_0 = arith.constant 0 : i32
    return %c0_i32 : i32
  }
  func.func @transform_4(%arg0: i32) -> i32 {
    %c0_i32 = arith.constant 0 : i32
    %c0_i32_0 = arith.constant 0 : i32
    return %c0_i32 : i32
  }
  func.func @transform_5(%arg0: i32) -> (i32, i32, i32) {
    %c0_i32 = arith.constant 0 : i32
    %c0_i32_0 = arith.constant 0 : i32
    %c0_i32_1 = arith.constant 0 : i32
    return %arg0, %c0_i32, %c0_i32_0 : i32, i32, i32
  }
}

</mosaic_0001>

<bundles_post_ra>
// kernel: tpu_custom_call.1
= control target key start
LH: loop header
LB: loop body
LE: loop exit
PB: predicated region body
PF: predicated region fallthrough
CT: control target
= control target key end

     0   :  { %s1329_s0 = inlined_call_operand.hbm [shape: f32[4,8,256], index: 0, kind: input, shape index: {}]   ;;  %s1330_s1 = inlined_call_operand.vmem [shape: f32[2,8], index: 1, kind: input, shape index: {}]   ;;  %s1331_s2 = inlined_call_operand.vmem [shape: f32[8,2], index: 2, kind: input, shape index: {}]   ;;  %s1332_s3 = inlined_call_operand.vmem [shape: f32[9], index: 3, kind: input, shape index: {}]   ;;  %s1333_s4 = inlined_call_operand.<no memory space> [shape: f32[1], index: 4, kind: input, shape index: {}]   ;;  %s1334_s5 = inlined_call_operand.hbm [shape: f32[4,8,256], index: 5, kind: output, shape index: {}]  }
   0x1   :  { %1335 = sst [smem:[#allocation12_spill]] %s1332_s3 }
   0x2   :  { %10 = sst [smem:[#allocation2]] %s1333_s4 }
   0x3   :  { %11 = vsyncpa [#allocation4], 0 }
   0x4   :  { %13 = vsyncpa [#allocation4 + $0x1], 0 }
   0x5   :  { %14 = vsyncpa [#allocation6], 0 }
   0x6   :  { %15 = vsyncpa [#allocation5], 0 }
   0x7   :  { %17 = vsyncpa [#allocation5 + $0x1], 0  ;;  %s1066_s20 = smov 0   ;;  %s1068_s21 = smov 0  }
   0x8   :  { %s1070_s22 = smov 0   ;;  %s1072_s23 = smov 0  }
   0x9 LB: > { %s1087_s4 = sadd.s32 4294967295, %s1015_s23   ;;  %s766_s24 = sadd.s32 4294967294, %s1015_s23   ;;  %s1015_s23 = sphi %s1072_s23, %s1349_s23   ;;  %s1011_s22 = sphi %s1070_s22, %s1348_s22   ;;  %s1007_s21 = sphi %s1068_s21, %s1347_s21   ;;  %s1003_s20 = sphi %s1066_s20, %s1346_s20  }
   0xa   : > { %s1091_s25 = sadd.s32 1, %s1015_s23   ;;  %s30_s26 = sadd.s32 1, %s1011_s22 }
   0xb   : > { %s27_s27 = ssub.s32 %s1015_s23, %s1091_s25  ;;  %p37_p0 = scmp.ne.s32.totalorder %s1011_s22, %s1007_s21 }
   0xc   : > { %p28_p1 = scmp.eq.s32.totalorder %s27_s27, 0  ;;  %p38_p2 = scmp.eq.s32.totalorder %s1015_s23, 0 }
   0xd   : > { %p43_p3 = scmp.ne.s32.totalorder %s1007_s21, %s1003_s20  ;;  %p44_p4 = scmp.eq.s32.totalorder %s1087_s4, 0 }
   0xe   : > { %s1103_s28 = scalar_select %p28_p1, %s1011_s22, %s30_s26  }
   0xf   : > { %p1105_p5 = por %p38_p2, %p37_p0  ;;  %p1111_p6 = por %p44_p4, %p43_p3 }
  0x10   : > { %p151_p7 = scmp.eq.s32.totalorder %s1087_s4, 1  ;;  %p157_p8 = scmp.eq.s32.totalorder %s766_s24, 1 }
  0x11   : > { %p767_p9 = scmp.ge.s32.totalorder %s1015_s23, 1  ;;  %p164_p10 = scmp.lt.s32.totalorder %s1015_s23, 3 }
  0x12   : > { %p1118_p11 = por %p151_p7, %p37_p0  ;;  %p1122_p12 = por %p157_p8, %p43_p3 }
  0x13   : > { %p1126_p13 = pnand %p767_p9, %p164_p10  ;;  %s1341_s3 = sld [smem:[#allocation12_spill]] }
  0x14   : > { %p833_p2 = scmp.lt.s32.totalorder %s1015_s23, 2  ;;  %s196_s12 = sand.u32 1, %s1011_s22  }
  0x15   : > { %p820_p1 = pneg %p1126_p13  ;;  %s770_s14 = sshll.u32 %s196_s12, 5 }
  0x16   : > { %p1142_p3 = pnand %p833_p2, %p1105_p5  ;;  %s1017_s15 = smov [#allocation7]  }
  0x17   : > { %p821_p7 = pnand %p820_p1, %p44_p4  ;;  %s809_s16 = sshll.u32 %s1015_s23, 5 }
  0x18   : > { %s200_s17 = scalar_lea.vmem [#allocation3], %s770_s14  ;;  %s206_s26 = scalar_lea.hbm %s1329_s0, %s809_s16 }
  0x19   : > { %s182_s11 = sshll.u32 %s1341_s3, 4  ;;  %s209_s18 = sshll.u32 %s200_s17, 4  ;;  %s183_s11 = int_to_ptr.vmem [resolvable:$true] %s182_s11  ;;  %s210_s18 = int_to_ptr.vmem [resolvable:$true] %s209_s18 }
  0x1a   : > { %823 = dma.vmem_to_smem (!%p821_p7), %s183_s11, 16, %s1017_s15, [#allocation6]  }
  0x1b   : > { %s207_s27 = sshll.u32 %s206_s26, 4  ;;  %s197_s9 = scalar_lea.sflag [#allocation4], %s196_s12  ;;  %s208_s27 = int_to_ptr.hbm [resolvable:$true] %s207_s27 }
  0x1c   : > { %s915_s29 = sshra.s32 %s208_s27, 4  ;;  %p919_p8 = pneg %p1142_p3  ;;  %s916_s29 = int_to_ptr.hbm [resolvable:$true] %s915_s29 }
  0x1d   : > { %s917_s10 = scalar_lea.hbm %s916_s29, 32  ;;  %s922_s14 = scalar_lea.hbm %s1329_s0, 64 }
  0x1e   : > { %p918_p5 = scmp.ne.s32.totalorder %s916_s29, %s917_s10  ;;  %p923_p1 = scmp.lt.s32.totalorder %s916_s29, %s1329_s0 }
  0x1f   : > { %p924_p2 = scmp.lt.s32.totalorder %s922_s14, %s917_s10 }
  0x20   : > { %p920_p9 = pnand %p919_p8, %p918_p5 }
  0x21   : > { %p925_p7 = por %p924_p2, %p923_p1 }
  0x22   : > { %p921_p10 = pneg %p920_p9 }
  0x24   : > { %p926_p0 = pnand %p925_p7, %p921_p10 }
  0x26   : > { %929 = shalt.err (!%p926_p0)
}
  0x27   : > { %s1018_s12 = smov 256   ;;  %s1019_s16 = smov 16  }
  0x28   : > { %827 = dma.hbm_to_vmem [thread:$0]  (!%p1142_p3), %s208_s27, 512, %s210_s18, %s197_s9, %s1018_s12, %s1018_s12, %s1019_s16  }
  0x29   : > { %221 = sbr.rel (%p1126_p13) target bundleno = 589 (0x24d), region = 40  ;;  %s1163_s19 = sand.u32 (!%p1126_p13), 1, %s1007_s21  }
  0x2a   : > { %s775_s3 = sshll.u32 (!%p1126_p13), %s1163_s19, 5  ;;  %s224_s24 = scalar_lea.sflag (!%p1126_p13), [#allocation4], %s1163_s19 }
  0x2b   : > { %s227_s26 = scalar_lea.vmem (!%p1126_p13), [#allocation3], %s775_s3 }
  0x2e   : > { %990 = dma.done.wait (%p1111_p6), %s224_s24, 512  }
  0x2f   : > { %992 = vsyncadd (%p1111_p6), %s224_s24, 4294966784 }
  0x30   : > { %994 = dma.done.wait (%p44_p4), [#allocation6], 16  }
  0x31   : > { %996 = vsyncadd (%p44_p4), [#allocation6], 4294967280 }
  0x32   : > { %238 = sfence }
  0x33   : > { %v1177_v0 = vld [vmem:[%s227_s26] sm:$0xff]  ;;  %v1179_v1 = vld [vmem:[%s227_s26 + $0x8] sm:$0xff]  ;;  %v1183_v3 = vld [vmem:[%s227_s26 + $0x10] sm:$0xff]  ;;  %vm339_vm0 = vcmask 7168   ;;  %vm345_vm1 = vcmask 64512   ;;  %v1020_v12 = vmov 8.0  }
  0x34   : > { %v265_v2 = vadd.f32 %v1179_v1, %v1177_v0  ;;  %v1185_v4 = vld [vmem:[%s227_s26 + $0x18] sm:$0xff]  ;;  %v344_v10 = vld [vmem:[%s1330_s1] sm:$0x3]  ;;  %886 = vrcp.f32 %v1020_v12  ;;  %v269_v13 = vrot.slane %v1177_v0, 4  ;;  %v311_v14 = vrot.slane %v1183_v3, 4  ;;  %s1021_s13 = smov 17  }
  0x35   : > { %v307_v5 = vadd.f32 %v1185_v4, %v1183_v3  ;;  %v275_v19 = vrot.slane %v1179_v1, 4  ;;  %v317_v20 = vrot.slane %v1185_v4, 4  ;;  %vm341_vm3 = vcmask 1040384   ;;  %s1022_s18 = smov 16   ;;  %s1023_s27 = smov 15  }
  0x36   : > { %266 = vadd.xlane.f32.xlu0 %v265_v2  ;;  %v270_v16 = vadd.f32 %v269_v13, %v1177_v0  ;;  %v312_v17 = vadd.f32 %v1183_v3, %v311_v14  ;;  %v291_v22 = vmax.f32 %v1177_v0, %v269_v13  ;;  %v326_v24 = vmax.f32 %v1183_v3, %v311_v14  ;;  %s1024_s9 = smov 113   ;;  %s1025_s29 = smov 1  }
  0x37   : > { %v276_v26 = vadd.f32 %v275_v19, %v1179_v1  ;;  %v318_v27 = vadd.f32 %v1185_v4, %v317_v20  ;;  %v297_v33 = vmax.f32 %v1179_v1, %v275_v19  ;;  %v332_v36 = vmax.f32 %v1185_v4, %v317_v20  ;;  %s1026_s10 = smov 111   ;;  %s1027_s11 = smov 127  }
  0x38   : > { %v271_v21 = vrot.slane %v270_v16, 2  ;;  %v313_v23 = vrot.slane %v312_v17, 2  ;;  %v292_v29 = vrot.slane %v291_v22, 2  ;;  %v327_v31 = vrot.slane %v326_v24, 2  ;;  %s1028_s17 = smov 112   ;;  %s1232_s12 = sld [smem:[#allocation7 + $0x4]] }
  0x39   : > { %v277_v34 = vrot.slane %v276_v26, 2  ;;  %v319_v35 = vrot.slane %v318_v27, 2  ;;  %v298_v42 = vrot.slane %v297_v33, 2  ;;  %v333_v45 = vrot.slane %v332_v36, 2  ;;  %s1234_s16 = sld [smem:[#allocation7]] }
  0x3a   : > { %v887_v15 = vpop.eup %886  ;;  %v272_v28 = vadd.f32 %v271_v21, %v270_v16  ;;  %v314_v30 = vadd.f32 %v313_v23, %v312_v17  ;;  %v293_v38 = vmax.f32 %v291_v22, %v292_v29  ;;  %v328_v40 = vmax.f32 %v326_v24, %v327_v31  ;;  %s1236_s24 = sld [smem:[#allocation7 + $0x1]] }
  0x3b   : > { %v282_v18 = vmul.f32 8.0, %v887_v15  ;;  %v278_v43 = vadd.f32 %v277_v34, %v276_v26  ;;  %vm286_vm2 = vweird.f32 %v887_v15  ;;  %v320_v44 = vadd.f32 %v319_v35, %v318_v27  ;;  %s1246_s26 = sld [smem:[#allocation7 + $0x2]] }
  0x3c   : > { %v273_v37 = vrot.slane %v272_v28, 1  ;;  %v315_v39 = vrot.slane %v314_v30, 1  ;;  %v294_v47 = vrot.slane %v293_v38, 1  ;;  %v329_v49 = vrot.slane %v328_v40, 1  ;;  %s1259_s30 = sld [smem:[#allocation7 + $0x3]] }
  0x3d   : > { %v283_v25 = vsub.f32 1.0, %v282_v18  ;;  %v279_v51 = vrot.slane %v278_v43, 1  ;;  %v299_v52 = vmax.f32 %v297_v33, %v298_v42  ;;  %v321_v53 = vrot.slane %v320_v44, 1  ;;  %s1269_s8 = sld [smem:[#allocation7 + $0x5]] }
  0x3e   : > { %308 = vadd.xlane.f32.xlu0 %v307_v5  ;;  %v274_v46 = vadd.f32 %v273_v37, %v272_v28  ;;  %v316_v48 = vadd.f32 %v315_v39, %v314_v30  ;;  %v334_v54 = vmax.f32 %v332_v36, %v333_v45  ;;  %v295_v56 = vmax.f32 %v293_v38, %v294_v47 }
  0x3f   : > { %v284_v32 = vmul.f32 %v887_v15, %v283_v25  ;;  %v330_v58 = vmax.f32 %v328_v40, %v329_v49  ;;  %v280_v59 = vadd.f32 %v279_v51, %v278_v43  ;;  %v300_v60 = vrot.slane %v299_v52, 1 }
  0x40   : > { %v322_v61 = vadd.f32 %v321_v53, %v320_v44  ;;  %v335_v62 = vrot.slane %v334_v54, 1  ;;  %vm375_vm4 = vcmask 1041408   ;;  %vm371_vm5 = vcmask 15360  }
  0x41   : > { %v285_v41 = vadd.f32 %v887_v15, %v284_v32  ;;  %v1029_v16 = vmov 1   ;;  %v1030_v17 = vmov 0   ;;  %v418_v23 = vlaneseq }
  0x42   : > { %885 = vset.pattern.permute.xlu0 %v1029_v16  ;;  %884 = vset.pattern.permute.xlu2 %v1030_v17  ;;  %vm467_vm6 = vcmask 138240   ;;  %v1031_v38 = vmov 0.0   ;;  %v458_v45 = vstv %s1232_s12  ;;  %v475_v49 = vstv %s1234_s16 }
  0x43   : > { %v287_v50 = vsel %vm286_vm2, %v887_v15, %v285_v41  ;;  %v370_v15 = vld [vmem:[%s1331_s2] sm:$0xff]  ;;  %v419_v24 = vand.u32 127, %v418_v23  ;;  %vm484_vm11 = vcmask 130048   ;;  %vm499_vm15 = vcmask 121856  }
  0x44   : > { %v288_v55 = vmul.f32 %v287_v50, %v274_v46  ;;  %v323_v57 = vmul.f32 %v316_v48, %v287_v50  ;;  %v289_v5 = vmul.f32 %v287_v50, %v280_v59  ;;  %vm532_vm2 = vcmask 1039360  }
  0x45   : > { %v420_v29 = vadd.s32 128, %v419_v24  ;;  %v425_v30 = vand.u32 15, %v419_v24  ;;  %v523_v23 = vstv %s1259_s30 }
  0x46   : > { %v302_v63 = vadd.f32 %v295_v56, %v288_v55  ;;  %v337_v2 = vadd.f32 %v330_v58, %v323_v57  ;;  %v490_v55 = vstv %s1236_s24 }
  0x47   : > { %v432_v31 = vand.u32 15, %v420_v29  ;;  %vm445_vm7 = vcmp.ne.s32.totalorder %v425_v30, 0 }
  0x48   : > { %v1238_v39 = vsel %vm445_vm7, 1.0, %v1031_v38 }
  0x49   : > { %vm446_vm8 = vcmp.ne.s32.totalorder %v432_v31, 0  ;;  %vm1248_vm14 = vcmp.ne.s32.totalorder %v432_v31, 15 }
  0x4a   : > { %v1240_v40 = vsel %vm446_vm8, 1.0, %v1031_v38 }
  0xa9   : > { %v267_v6 = vpop.xlane.xlu0 %266 }
  0xaa   : > { %v268_v8 = vmul.f32 0.00390625, %v267_v6  ;;  %v301_v6 = vmax.f32 %v299_v52, %v300_v60 }
  0xb1   : > { %v309_v7 = vpop.xlane.xlu0 %308 }
  0xb2   : > { %v310_v9 = vmul.f32 0.00390625, %v309_v7  ;;  %v324_v7 = vmul.f32 %v322_v61, %v287_v50 }
  0xb4   : > { %v340_v11 = vsel %vm339_vm0, %v268_v8, %v310_v9  ;;  %v336_v8 = vmax.f32 %v334_v54, %v335_v62  ;;  %v1205_v9 = vsel %vm341_vm3, %v302_v63, %v337_v2  ;;  %v1263_v2 = vsel %vm1248_vm14, 1.0, %v1031_v38 }
  0xb5   : > { %364 = vmatpush.msra.mxu0 %v340_v11  ;;  %463 = vrot.lane.b32.xlu1 %v1205_v9, %s1021_s13  ;;  %v459_v56 = vmul.f32 %v458_v45, %v1205_v9 }
  0xb6   : > { %780 = vmatmul.msk.f32.vlgmr.msra.gmra.mxu0 %vm345_vm1, %v344_v10  ;;  %480 = vrot.lane.b32.xlu2 %v1205_v9, %s1022_s18  ;;  %v303_v10 = vadd.f32 %v301_v6, %v289_v5  ;;  %v338_v11 = vadd.f32 %v336_v8, %v324_v7  ;;  %vm451_vm1 = vcmp.ne.s32.totalorder %v425_v30, 15  ;;  %v540_v30 = vstv %s1269_s8  ;;  %s965_s8 = scalar_lea.hbm %s1334_s5, 64 }
  0xb7   : > { %495 = vrot.lane.b32.xlu0 %v1205_v9, %s1023_s27  ;;  %v1266_v6 = vsel %vm451_vm1, 1.0, %v1031_v38 }
  0xb8   : > { %v1211_v12 = vsel %vm341_vm3, %v303_v10, %v338_v11  ;;  %vm549_vm3 = vcmask 924672  }
  0xb9   : > { %v460_v62 = vmul.f32 %v458_v45, %v1211_v12 }
  0xbd   : > { %465 = vrot.lane.b32.xlu1 %v1211_v12, %s1021_s13  ;;  %s793_s13 = sld [smem:[#allocation7 + $0x6]] }
  0xbe   : > { %482 = vrot.lane.b32.xlu2 %v1211_v12, %s1022_s18 }
  0xbf   : > { %547 = vrot.lane.b32.xlu0 %v1211_v12, %s1024_s9 }
  0xc3   : > { %v557_v45 = vstv %s793_s13 }
  0xc5   : > { %497 = vrot.lane.b32.xlu1 %v1211_v12, %s1023_s27  ;;  %s1281_s27 = sld [smem:[#allocation7 + $0x7]] }
  0xc6   : > { %512 = vrot.lane.b32.xlu2 %v1205_v9, %s1025_s29 }
  0xc7   : > { %577 = vrot.lane.b32.xlu0 %v1205_v9, %s1026_s10 }
  0xcd   : > { %514 = vrot.lane.b32.xlu1 %v1211_v12, %s1025_s29  ;;  %s594_s29 = sld [smem:[#allocation2]] }
  0xce   : > { %528 = vrot.lane.b32.xlu2 %v1205_v9, %s1027_s11 }
  0xd5   : > { %530 = vrot.lane.b32.xlu1 %v1211_v12, %s1027_s11  ;;  %s811_s11 = sshll.u32 %s1087_s4, 5  ;;  %s665_s4 = scalar_lea.sflag [#allocation5], %s1163_s19 }
  0xd6   : > { %545 = vrot.lane.b32.xlu2 %v1205_v9, %s1024_s9  ;;  %s795_s9 = sld [smem:[#allocation7 + $0x8]] }
  0xdd   : > { %562 = vrot.lane.b32.xlu1 %v1205_v9, %s1028_s17 }
  0xde   : > { %564 = vrot.lane.b32.xlu2 %v1211_v12, %s1028_s17  ;;  %s677_s17 = scalar_lea.hbm %s1334_s5, %s811_s11 }
  0xdf   : > { %s680_s16 = sshll.u32 %s677_s17, 4  ;;  %s681_s16 = int_to_ptr.hbm [resolvable:$true] %s680_s16 }
  0xe5   : > { %579 = vrot.lane.b32.xlu1 %v1211_v12, %s1026_s10  ;;  %s260_s10 = scalar_lea.vmem [#allocation8], %s775_s3  ;;  %s959_s3 = sshra.s32 %s681_s16, 4  ;;  %s960_s3 = int_to_ptr.hbm [resolvable:$true] %s959_s3 }
  0xe6   : > { %s678_s12 = sshll.u32 %s260_s10, 4  ;;  %s961_s24 = scalar_lea.hbm %s960_s3, 32  ;;  %s679_s12 = int_to_ptr.vmem [resolvable:$true] %s678_s12 }
  0xe7   : > { %p962_p4 = scmp.ne.s32.totalorder %s960_s3, %s961_s24  ;;  %p966_p0 = scmp.lt.s32.totalorder %s960_s3, %s1334_s5 }
  0xe8   : > { %p967_p3 = scmp.lt.s32.totalorder %s965_s8, %s961_s24 }
  0xe9   : > { %p963_p6 = pnand %p962_p4, %p1118_p11 }
  0xea   : > { %p968_p5 = por %p967_p3, %p966_p0 }
  0xeb   : > { %p964_p13 = pneg %p963_p6 }
  0xed   : > { %p969_p8 = pnand %p968_p5, %p964_p13 }
 0x110   : > { %v1230_v19 = vpop.permute.xlu2 %480 }
 0x111   : > { %v488_v60 = vsel %vm484_vm11, 0.0, %v1230_v19 }
 0x112   : > { %v491_v8 = vmul.f32 %v490_v55, %v488_v60 }
 0x118   : > { %v483_v25 = vpop.permute.xlu2 %482 }
 0x119   : > { %v485_v63 = vsel %vm484_vm11, %v1230_v19, %v483_v25 }
 0x11a   : > { %v492_v11 = vmul.f32 %v490_v55, %v485_v63 }
 0x120   : > { %v513_v32 = vpop.permute.xlu2 %512 }
 0x121   : > { %v519_v16 = vsel %vm339_vm0, 0.0, %v513_v32 }
 0x122   : > { %v520_v24 = vmul.f32 %v1238_v39, %v519_v16 }
 0x127   : > { %v464_v18 = vpop.permute.xlu1 %463 }
 0x128   : > { %v471_v36 = vsel %vm467_vm6, 0.0, %v464_v18  ;;  %v529_v52 = vpop.permute.xlu2 %528 }
 0x129   : > { %v472_v46 = vmul.f32 %v1238_v39, %v471_v36  ;;  %v496_v58 = vpop.permute.xlu0 %495 }
 0x12a   : > { %v503_v7 = vsel %vm499_vm15, 0.0, %v496_v58 }
 0x12b   : > { %v476_v59 = vmul.f32 %v475_v49, %v472_v46 }
 0x12d   : > { %v478_v9 = vadd.f32 %v476_v59, %v459_v56 }
 0x12f   : > { %v466_v20 = vpop.permute.xlu1 %465  ;;  %v493_v17 = vadd.f32 %v491_v8, %v478_v9 }
 0x130   : > { %v468_v41 = vsel %vm467_vm6, %v464_v18, %v466_v20 }
 0x131   : > { %v473_v47 = vmul.f32 %v1240_v40, %v468_v41 }
 0x133   : > { %v366_v13 = vpop.f32.mrf.mxu0  ;;  %v477_v61 = vmul.f32 %v475_v49, %v473_v47 }
 0x134   : > { %v369_v14 = vmax.f32 %v366_v13, 0.0 }
 0x135   : > { %v479_v10 = vadd.f32 %v477_v61, %v460_v62  ;;  %v589_v62 = vstv %s795_s9 }
 0x136   : > { %781 = vmatpush.msk.msra.mxu1 %vm375_vm4, %v369_v14  ;;  %v507_v14 = vstv %s1246_s26  ;;  %vm581_vm4 = vcmask 908288  }
 0x137   : > { %782 = vmatmul.msk.f32.vlgmr.msra.gmra.mxu1 %vm371_vm5, %v370_v15  ;;  %v498_v26 = vpop.permute.xlu1 %497  ;;  %v504_v15 = vmul.f32 %v1266_v6, %v503_v7  ;;  %v494_v18 = vadd.f32 %v492_v11, %v479_v10  ;;  %v595_v11 = vstv %s594_s29 }
 0x138   : > { %v500_v5 = vsel %vm499_vm15, %v496_v58, %v498_v26 }
 0x139   : > { %v505_v12 = vmul.f32 %v1263_v2, %v500_v5  ;;  %v508_v26 = vmul.f32 %v507_v14, %v504_v15 }
 0x13b   : > { %v509_v20 = vmul.f32 %v507_v14, %v505_v12 }
 0x13f   : > { %v515_v33 = vpop.permute.xlu1 %514 }
 0x140   : > { %v516_v13 = vsel %vm339_vm0, %v513_v32, %v515_v33  ;;  %v511_v32 = vadd.f32 %v509_v20, %v494_v18  ;;  %v524_v33 = vmul.f32 %v523_v23, %v520_v24  ;;  %vm566_vm0 = vcmask 916480  }
 0x141   : > { %v521_v19 = vmul.f32 %v1240_v40, %v516_v13 }
 0x143   : > { %v525_v29 = vmul.f32 %v523_v23, %v521_v19 }
 0x145   : > { %v527_v41 = vadd.f32 %v525_v29, %v511_v32 }
 0x147   : > { %v531_v54 = vpop.permute.xlu1 %530 }
 0x148   : > { %v536_v25 = vsel %vm532_vm2, %v531_v54, 0.0 }
 0x149   : > { %v538_v31 = vmul.f32 %v1263_v2, %v536_v25 }
 0x14b   : > { %v542_v38 = vmul.f32 %v540_v30, %v538_v31 }
 0x1b4   : > { %v396_v21 = vpop.f32.mrf.mxu1 }
 0x1b5   : > { %v783_v22 = vmul.f32 -1.442695, %v396_v21  ;;  %v546_v21 = vpop.permute.xlu2 %545 }
 0x1b7   : > { %888 = vpow2.f32 %v783_v22  ;;  %v563_v22 = vpop.permute.xlu1 %562 }
 0x1bd   : > { %v889_v27 = vpop.eup %888  ;;  %v565_v47 = vpop.permute.xlu2 %564 }
 0x1be   : > { %v402_v28 = vadd.f32 1.0, %v889_v27  ;;  %v548_v27 = vpop.permute.xlu0 %547  ;;  %v570_v55 = vsel %vm566_vm0, %v565_v47, 0.0 }
 0x1bf   : > { %v553_v36 = vsel %vm549_vm3, %v548_v27, 0.0 }
 0x1c0   : > { %890 = vrcp.f32 %v402_v28  ;;  %v414_v42 = vand.u32 2147483648, %v402_v28  ;;  %v412_v44 = vand.u32 2147483647, %v402_v28  ;;  %vm408_vm10 = vweird.f32 %v402_v28 }
 0x1c2   : > { %v415_v50 = vor.u32 1.1754944e-38, %v414_v42  ;;  %vm413_vm13 = vcmp.eq.f32.partialorder %v412_v44, 8.507059e+37  ;;  %v555_v42 = vmul.f32 %v1240_v40, %v553_v36 }
 0x1c6   : > { %v891_v34 = vpop.eup %890  ;;  %v578_v49 = vpop.permute.xlu0 %577 }
 0x1c7   : > { %v404_v35 = vmul.f32 %v891_v34, %v402_v28  ;;  %vm409_vm9 = vweird.f32 %v891_v34  ;;  %v533_v28 = vsel %vm532_vm2, %v529_v52, %v531_v54  ;;  %v544_v52 = vadd.f32 %v542_v38, %v527_v41 }
 0x1c8   : > { %vm410_vm12 = vmor %vm408_vm10, %vm409_vm9 }
 0x1c9   : > { %v405_v37 = vsub.f32 1.0, %v404_v35  ;;  %v510_v35 = vadd.f32 %v508_v26, %v493_v17 }
 0x1cb   : > { %v406_v43 = vmul.f32 %v891_v34, %v405_v37  ;;  %v550_v37 = vsel %vm549_vm3, %v546_v21, %v548_v27  ;;  %v526_v44 = vadd.f32 %v524_v33, %v510_v35 }
 0x1cc   : > { %v554_v46 = vmul.f32 %v1238_v39, %v550_v37 }
 0x1cd   : > { %v407_v48 = vadd.f32 %v891_v34, %v406_v43 }
 0x1ce   : > { %v558_v53 = vmul.f32 %v557_v45, %v554_v46 }
 0x1cf   : > { %v411_v51 = vsel %vm410_vm12, %v891_v34, %v407_v48  ;;  %v537_v34 = vmul.f32 %v1266_v6, %v533_v28  ;;  %v580_v48 = vpop.permute.xlu1 %579 }
 0x1d0   : > { %v416_v57 = vsel %vm413_vm13, %v415_v50, %v411_v51  ;;  %v559_v50 = vmul.f32 %v557_v45, %v555_v42  ;;  %v572_v51 = vstv %s1281_s27  ;;  %v585_v56 = vsel %vm581_vm4, %v580_v48, 0.0 }
 0x1d1   : > { %652 = vperm.xlu0 %885, %v416_v57   ;;  %638 = vperm.xlu2 %884, %v416_v57   ;;  %v541_v43 = vmul.f32 %v540_v30, %v537_v34  ;;  %v567_v57 = vsel %vm566_vm0, %v563_v22, %v565_v47  ;;  %v582_v40 = vsel %vm581_vm4, %v578_v49, %v580_v48 }
 0x1d2   : > { %v561_v58 = vadd.f32 %v559_v50, %v544_v52  ;;  %v574_v59 = vmul.f32 %v572_v51, %v570_v55  ;;  %v587_v60 = vmul.f32 %v1263_v2, %v585_v56  ;;  %v573_v61 = vmul.f32 %v572_v51, %v567_v57 }
 0x1d3   : > { %v543_v54 = vadd.f32 %v541_v43, %v526_v44  ;;  %v586_v63 = vmul.f32 %v1266_v6, %v582_v40 }
 0x1d4   : > { %v576_v5 = vadd.f32 %v574_v59, %v561_v58  ;;  %v591_v7 = vmul.f32 %v589_v62, %v587_v60 }
 0x1d5   : > { %v560_v39 = vadd.f32 %v558_v53, %v543_v54  ;;  %v590_v9 = vmul.f32 %v589_v62, %v586_v63 }
 0x1d6   : > { %v593_v10 = vadd.f32 %v591_v7, %v576_v5 }
 0x1d7   : > { %v575_v8 = vadd.f32 %v573_v61, %v560_v39 }
 0x1d8   : > { %v597_v13 = vadd.f32 %v595_v11, %v593_v10 }
 0x1d9   : > { %v592_v12 = vadd.f32 %v590_v9, %v575_v8 }
 0x1da   : > { %v797_v15 = vmul.f32 -1.442695, %v597_v13 }
 0x1db   : > { %v596_v14 = vadd.f32 %v595_v11, %v592_v12 }
 0x1dc   : > { %892 = vpow2.f32 %v797_v15 }
 0x1dd   : > { %v796_v16 = vmul.f32 -1.442695, %v596_v14 }
 0x1df   : > { %894 = vpow2.f32 %v796_v16 }
 0x1e2   : > { %v893_v2 = vpop.eup %892 }
 0x1e3   : > { %v605_v18 = vadd.f32 1.0, %v893_v2 }
 0x1e5   : > { %v895_v17 = vpop.eup %894  ;;  %896 = vrcp.f32 %v605_v18  ;;  %vm626_vm7 = vweird.f32 %v605_v18  ;;  %v632_v28 = vand.u32 2147483648, %v605_v18  ;;  %v630_v32 = vand.u32 2147483647, %v605_v18 }
 0x1e6   : > { %v604_v19 = vadd.f32 1.0, %v895_v17 }
 0x1e7   : > { %v633_v34 = vor.u32 1.1754944e-38, %v632_v28  ;;  %vm631_vm12 = vcmp.eq.f32.partialorder %v630_v32, 8.507059e+37 }
 0x1e8   : > { %898 = vrcp.f32 %v604_v19  ;;  %vm611_vm5 = vweird.f32 %v604_v19  ;;  %v617_v27 = vand.u32 2147483648, %v604_v19  ;;  %v615_v30 = vand.u32 2147483647, %v604_v19 }
 0x1ea   : > { %v618_v33 = vor.u32 1.1754944e-38, %v617_v27  ;;  %vm616_vm11 = vcmp.eq.f32.partialorder %v615_v30, 8.507059e+37 }
 0x1eb   : > { %v897_v6 = vpop.eup %896 }
 0x1ec   : > { %v622_v22 = vmul.f32 %v897_v6, %v605_v18  ;;  %vm627_vm8 = vweird.f32 %v897_v6 }
 0x1ed   : > { %vm628_vm10 = vmor %vm626_vm7, %vm627_vm8 }
 0x1ee   : > { %v899_v20 = vpop.eup %898  ;;  %v623_v24 = vsub.f32 1.0, %v622_v22 }
 0x1ef   : > { %v607_v21 = vmul.f32 %v899_v20, %v604_v19  ;;  %vm612_vm6 = vweird.f32 %v899_v20 }
 0x1f0   : > { %v624_v26 = vmul.f32 %v897_v6, %v623_v24  ;;  %vm613_vm9 = vmor %vm611_vm5, %vm612_vm6 }
 0x1f1   : > { %v608_v23 = vsub.f32 1.0, %v607_v21 }
 0x1f2   : > { %v625_v31 = vadd.f32 %v897_v6, %v624_v26 }
 0x1f3   : > { %v609_v25 = vmul.f32 %v899_v20, %v608_v23 }
 0x1f4   : > { %v629_v36 = vsel %vm628_vm10, %v897_v6, %v625_v31 }
 0x1f5   : > { %v610_v29 = vadd.f32 %v899_v20, %v609_v25  ;;  %v634_v38 = vsel %vm631_vm12, %v633_v34, %v629_v36 }
 0x1f6   : > { %v642_v42 = vperm.slane %v634_v38, 0  ;;  %v656_v49 = vperm.slane %v634_v38, 1 }
 0x1f7   : > { %v614_v35 = vsel %vm613_vm9, %v899_v20, %v610_v29 }
 0x1f8   : > { %v619_v37 = vsel %vm616_vm11, %v618_v33, %v614_v35 }
 0x1f9   : > { %v641_v41 = vperm.slane %v619_v37, 0  ;;  %v655_v48 = vperm.slane %v619_v37, 1 }
 0x22b   : > { %v639_v43 = vpop.permute.xlu2 %638 }
 0x22c   : > { %v643_v44 = vadd.f32 %v641_v41, %v639_v43  ;;  %v644_v45 = vadd.f32 %v642_v42, %v639_v43 }
 0x22e   : > { %v645_v46 = vmul.f32 %v643_v44, %v1177_v0  ;;  %v646_v47 = vmul.f32 %v644_v45, %v1179_v1 }
 0x230   : > { %647 = vst [vmem:[%s260_s10] sm:$0xff] %v645_v46 }
 0x231   : > { %648 = vst [vmem:[%s260_s10 + $0x8] sm:$0xff] %v646_v47 }
 0x243   : > { %v653_v50 = vpop.permute.xlu0 %652 }
 0x244   : > { %v657_v51 = vadd.f32 %v655_v48, %v653_v50  ;;  %v658_v52 = vadd.f32 %v656_v49, %v653_v50 }
 0x246   : > { %v659_v0 = vmul.f32 %v1183_v3, %v657_v51  ;;  %v660_v1 = vmul.f32 %v1185_v4, %v658_v52 }
 0x248   : > { %800 = vst [vmem:[%s260_s10 + $0x10] sm:$0xff] %v659_v0 }
 0x249   : > { %801 = vst [vmem:[%s260_s10 + $0x18] sm:$0xff] %v660_v1 }
 0x24a   : > { %972 = shalt.err (!%p969_p8)
}
 0x24b   : > { %s1032_s19 = smov 256  }
 0x24c   : > { %818 = dma.vmem_to_hbm [thread:$0]  (%p1118_p11), %s679_s12, 512, %s681_s16, %s665_s4, %s1032_s19, %s1032_s19, %s1022_s18  }
 0x24d PF: > { %s695_s9 = sand.u32 1, %s1003_s20   ;;  %p1345_p9 = scmp.ge.s32.totalorder %s1015_s23, 2 }
 0x24e   : > { %s696_s29 = scalar_lea.sflag [#allocation5], %s695_s9 }
 0x24f   : > { %p829_p10 = pnand %p1345_p9, %p1122_p12 }
 0x251   : > { %p830_p1 = pneg %p829_p10 }
 0x253   : > { %998 = dma.done.wait (%p830_p1), %s696_s29, 512  }
 0x254   : > { %1000 = vsyncadd (%p830_p1), %s696_s29, 4294966784  ;;  %p20_p2 = scmp.ge.s32.totalorder %s1091_s25, 4   ;;  %s1346_s20 = smov %s1007_s21 }
 0x255   : > { %s1347_s21 = smov %s1011_s22  ;;  %s1348_s22 = smov %s1103_s28 }
 0x256   : > { %s1349_s23 = smov %s1091_s25  ;;  %22 = sbr.rel (!%p20_p2) target bundleno = 9 (0x9), region = 92 }
 0x25b   :  { %702 = vsyncpa [#allocation4], 1 }
 0x25c   :  { %704 = vsyncpa [#allocation4 + $0x1], 1 }
 0x25d   :  { %705 = vsyncpa [#allocation5], 1 }
 0x25e   :  { %707 = vsyncpa [#allocation5 + $0x1], 1 }
 0x25f   :  { %708 = vsyncpa [#allocation6], 1 }
 0x260   :  { %710 = vsyncpa [#allocation6 + $0x1], 1 }

</bundles_post_ra>
